<compile_context>
chip_gen: v7x
topology: tpu7x:2x2x1
jax: 0.10.0
libtpu: 0.0.40
codegen_flags: <defaults>
</compile_context>

<pallas_src>
import functools

import jax
import jax.numpy as jnp
from jax.experimental import pallas as pl
from jax.experimental.pallas import tpu as pltpu


def _round_up(x, m):
    return (x + m - 1) // m * m


def _cdiv(a, b):
    return (a + b - 1) // b


def _vmem_physical_bytes():
    """Best-effort physical VMEM size; conservative 64 MiB fallback (v7x-safe)."""
    try:
        info = pltpu.get_tpu_info()
        v = getattr(info, "vmem_capacity_bytes", None)
        if v:
            return int(v)
    except Exception:
        pass
    try:
        kind = jax.devices()[0].device_kind.lower()
        if "v7" in kind:
            return 64 << 20
        if any(s in kind for s in ("v6", "v5", "v4")):
            return 128 << 20
    except Exception:
        pass
    return 64 << 20


# ---------------------------------------------------------------------------
# Kernels
# ---------------------------------------------------------------------------

def _ffn_resident_kernel(x_ref, w1_ref, b1_ref, w2_ref, b2_ref, o_ref):
    # Weights are full arrays with constant index_maps -> VMEM resident.
    x = x_ref[...].astype(w1_ref.dtype)                       # VPU cast per tile
    h = jnp.dot(x, w1_ref[...], preferred_element_type=jnp.float32)
    h = jnp.maximum(h + b1_ref[...], 0.0)                     # bias + ReLU in f32
    # Dropout (eval mode) == identity.
    out = jnp.dot(h.astype(w2_ref.dtype), w2_ref[...],
                  preferred_element_type=jnp.float32)
    o_ref[...] = (out + b2_ref[...]).astype(o_ref.dtype)


def _ffn_tiled_f32out_kernel(x_ref, w1_ref, b1_ref, w2_ref, b2_ref, o_ref):
    # Hidden axis tiled; f32 output block is resident across the hidden axis,
    # so accumulate directly into it (no scratch).
    h_idx = pl.program_id(1)

    @pl.when(h_idx == 0)
    def _():
        o_ref[...] = jnp.zeros_like(o_ref)

    x = x_ref[...].astype(w1_ref.dtype)
    h = jnp.dot(x, w1_ref[...], preferred_element_type=jnp.float32)
    h = jnp.maximum(h + b1_ref[...], 0.0)
    # Dropout (eval mode) == identity.
    o_ref[...] += jnp.dot(h.astype(w2_ref.dtype), w2_ref[...],
                          preferred_element_type=jnp.float32)

    @pl.when(h_idx == pl.num_programs(1) - 1)
    def _():
        o_ref[...] += b2_ref[...]


def _ffn_tiled_acc_kernel(x_ref, w1_ref, b1_ref, w2_ref, b2_ref, o_ref, acc_ref):
    # Hidden axis tiled; narrow output dtype -> keep an f32 accumulator.
    h_idx = pl.program_id(1)

    @pl.when(h_idx == 0)
    def _():
        acc_ref[...] = jnp.zeros_like(acc_ref)

    x = x_ref[...].astype(w1_ref.dtype)
    h = jnp.dot(x, w1_ref[...], preferred_element_type=jnp.float32)
    h = jnp.maximum(h + b1_ref[...], 0.0)
    # Dropout (eval mode) == identity.
    acc_ref[...] += jnp.dot(h.astype(w2_ref.dtype), w2_ref[...],
                            preferred_element_type=jnp.float32)

    @pl.when(h_idx == pl.num_programs(1) - 1)
    def _():
        o_ref[...] = (acc_ref[...] + b2_ref[...]).astype(o_ref.dtype)


# ---------------------------------------------------------------------------
# Wrapper
# ---------------------------------------------------------------------------

def prepare_ffn_params(w1, b1, w2, b2, compute_dtype=jnp.bfloat16):
    """Pad/cast the weights ONCE (hoisted out of the per-forward path).

    w1: [d_model, hidden], b1: [hidden], w2: [hidden, d_model], b2: [d_model]
    (stored pre-transposed relative to nn.Linear.weight).
    Padded columns/rows are zero so they contribute nothing to the result.
    """
    d_model, hidden = w1.shape
    dmp = _round_up(d_model, 128)
    hp = _round_up(hidden, 128)
    cd = jnp.dtype(compute_dtype)
    w1_p = jnp.pad(w1.astype(cd), ((0, dmp - d_model), (0, hp - hidden)))
    b1_p = jnp.pad(b1.astype(jnp.float32).reshape(1, hidden),
                   ((0, 0), (0, hp - hidden)))
    w2_p = jnp.pad(w2.astype(cd), ((0, hp - hidden), (0, dmp - d_model)))
    b2_p = jnp.pad(b2.astype(jnp.float32).reshape(1, d_model),
                   ((0, 0), (0, dmp - d_model)))
    return w1_p, b1_p, w2_p, b2_p


@functools.partial(jax.jit, static_argnames=("tm", "th"))
def positionwise_feed_forward(x, w1_p, b1_p, w2_p, b2_p, *, tm=512, th=1024):
    """x: [batch, seq, d_model] -> [batch, seq, d_model] (params from prepare_ffn_params)."""
    batch, seq, d_model = x.shape
    dmp, hp = w1_p.shape
    out_dtype = x.dtype
    M = batch * seq

    cb = jnp.dtype(w1_p.dtype).itemsize
    xb = jnp.dtype(x.dtype).itemsize
    ob = jnp.dtype(out_dtype).itemsize
    f32_out = jnp.dtype(out_dtype) == jnp.dtype(jnp.float32)

    cap = int(0.75 * _vmem_physical_bytes())         # per-generation budget

    # --- row tile selection (big tiles -> high flops per weight byte) ---
    tm = max(8, min(tm, _round_up(M, 8)))            # don't blow up tiny inputs
    # Megacore guard: keep >= 2 row tiles when there is enough work.
    if M > 256 and _cdiv(M, tm) < 2:
        tm = max(256, _round_up(_cdiv(M, 2), 256))

    weight_bytes = 2 * dmp * hp * cb + 4 * (hp + dmp)   # W1 + W2 + biases

    def resident_est(tm_):
        io = 2 * tm_ * dmp * (xb + ob)               # double-buffered x/out tiles
        inter = tm_ * hp * (4 + cb)                  # f32 hidden act + bf16 copy
        return 2 * weight_bytes + io + inter         # 2x weights (conservative)

    def tiled_est(tm_, th_):
        io = 2 * tm_ * dmp * (xb + ob)
        w = 2 * (dmp * th_ * cb + th_ * 4 + th_ * dmp * cb + dmp * 4)
        inter = tm_ * th_ * (4 + cb)
        acc = 0 if f32_out else tm_ * dmp * 4
        return io + w + inter + acc

    # --- prefer the resident-weight path (weights read from HBM once) ---
    use_resident = resident_est(tm) <= cap
    if not use_resident:
        t = tm
        while t > 256 and resident_est(t) > cap:
            t = max(256, t // 2)
        if resident_est(t) <= cap:
            tm = t
            use_resident = True

    if use_resident:
        th_sel = hp
        est = resident_est(tm)
    else:
        def _pick_th(target):
            target = max(128, min(target, hp))
            for cand in range(target - target % 128, 127, -128):
                if hp % cand == 0:                   # th must divide hp
                    return cand
            return 128

        th_sel = _pick_th(th)
        while tiled_est(tm, th_sel) > cap and th_sel > 128:
            th_sel = _pick_th(th_sel - 128)
        while tiled_est(tm, th_sel) > cap and tm > 256:
            tm = max(256, tm // 2)
        est = tiled_est(tm, th_sel)

    mp = _round_up(M, tm)
    vmem_limit = int(max(min(est + (4 << 20), cap), 32 << 20))

    # x stays in its original dtype; pad only when needed (cast happens in-kernel).
    x2 = x.reshape(M, d_model)
    if mp != M or dmp != d_model:
        x2 = jnp.pad(x2, ((0, mp - M), (0, dmp - d_model)))

    if use_resident:
        grid = (mp // tm,)
        in_specs = [
            pl.BlockSpec((tm, dmp), lambda i: (i, 0)),     # x row tile
            pl.BlockSpec((dmp, hp), lambda i: (0, 0)),     # W1 (resident)
            pl.BlockSpec((1, hp), lambda i: (0, 0)),       # b1 (resident)
            pl.BlockSpec((hp, dmp), lambda i: (0, 0)),     # W2 (resident)
            pl.BlockSpec((1, dmp), lambda i: (0, 0)),      # b2 (resident)
        ]
        out_specs = pl.BlockSpec((tm, dmp), lambda i: (i, 0))
        scratch_shapes = []
        kernel = _ffn_resident_kernel
        dims = ("parallel",)
    else:
        grid = (mp // tm, hp // th_sel)
        in_specs = [
            pl.BlockSpec((tm, dmp), lambda i, h: (i, 0)),      # x row tile
            pl.BlockSpec((dmp, th_sel), lambda i, h: (0, h)),  # W1 column tile
            pl.BlockSpec((1, th_sel), lambda i, h: (0, h)),    # b1 slice
            pl.BlockSpec((th_sel, dmp), lambda i, h: (h, 0)),  # W2 row tile
            pl.BlockSpec((1, dmp), lambda i, h: (0, 0)),       # b2
        ]
        out_specs = pl.BlockSpec((tm, dmp), lambda i, h: (i, 0))
        if f32_out:
            scratch_shapes = []
            kernel = _ffn_tiled_f32out_kernel
        else:
            scratch_shapes = [pltpu.VMEM((tm, dmp), jnp.float32)]
            kernel = _ffn_tiled_acc_kernel
        dims = ("parallel", "arbitrary")

    out = pl.pallas_call(
        kernel,
        out_shape=jax.ShapeDtypeStruct((mp, dmp), out_dtype),
        grid_spec=pltpu.PrefetchScalarGridSpec(
            num_scalar_prefetch=0,
            grid=grid,
            in_specs=in_specs,
            out_specs=out_specs,
            scratch_shapes=scratch_shapes,
        ),
        compiler_params=pltpu.CompilerParams(
            dimension_semantics=dims,
            vmem_limit_bytes=vmem_limit,
        ),
    )(x2, w1_p, b1_p, w2_p, b2_p)

    if mp != M or dmp != d_model:
        out = out[:M, :d_model]
    return out.reshape(batch, seq, d_model)


def _reference(x, w1, b1, w2, b2):
    h = jnp.maximum(x @ w1 + b1, 0.0)
    return h @ w2 + b2


if __name__ == "__main__":
    key = jax.random.PRNGKey(0)

    def run_case(batch, seq, d_model, hidden):
        k = jax.random.fold_in(key, d_model * 1000 + hidden)
        k_x, k_w1, k_b1, k_w2, k_b2 = jax.random.split(k, 5)
        x = jax.random.normal(k_x, (batch, seq, d_model), dtype=jnp.float32)
        # nn.Linear(d_model, hidden): weight (hidden, d_model) -> stored transposed.
        w1 = jax.random.normal(k_w1, (d_model, hidden), dtype=jnp.float32) * 0.1
        b1 = jax.random.normal(k_b1, (hidden,), dtype=jnp.float32) * 0.1
        # nn.Linear(hidden, d_model): weight (d_model, hidden) -> stored transposed.
        w2 = jax.random.normal(k_w2, (hidden, d_model), dtype=jnp.float32) * 0.1
        b2 = jax.random.normal(k_b2, (d_model,), dtype=jnp.float32) * 0.1

        # Weight cast/pad is hoisted: done once, reused for every forward.
        params = prepare_ffn_params(w1, b1, w2, b2)
        y = jax.block_until_ready(positionwise_feed_forward(x, *params))

        y_ref = _reference(x, w1, b1, w2, b2)
        assert y.shape == (batch, seq, d_model)
        # bf16 MXU operands (f32 accumulation) -> loosened tolerance vs f32 ref.
        assert jnp.allclose(y, y_ref, atol=5e-2, rtol=5e-2), "mismatch vs reference"

    run_case(2, 8, 32, 64)   # small, tile-aligned after 128-padding
    run_case(1, 5, 40, 72)   # exercises row + lane padding paths
    print("KERNEL_OK")
</pallas_src>

<mosaic_0001>
module attributes {stable_mosaic.version = 11 : i64} {
  func.func @_ffn_resident_kernel(%arg0: i32, %arg1: memref<16x128xf32, #tpu.memory_space<vmem>>, %arg2: memref<128x128xbf16, #tpu.memory_space<vmem>>, %arg3: memref<1x128xf32, #tpu.memory_space<vmem>>, %arg4: memref<128x128xbf16, #tpu.memory_space<vmem>>, %arg5: memref<1x128xf32, #tpu.memory_space<vmem>>, %arg6: memref<16x128xf32, #tpu.memory_space<vmem>>) attributes {dimension_semantics = [#tpu.dimension_semantics<parallel>], iteration_bounds = array<i64: 1>, scalar_prefetch = 0 : i64, scratch_operands = 0 : i64, tpu.core_type = #tpu.core_type<tc>, window_params = [{transform_indices = @transform_0, window_bounds = array<i64: 16, 128>}, {pipeline_mode = #tpu.pipeline_mode<synchronous>, transform_indices = @transform_1, window_bounds = array<i64: 128, 128>}, {pipeline_mode = #tpu.pipeline_mode<synchronous>, transform_indices = @transform_2, window_bounds = array<i64: 1, 128>}, {pipeline_mode = #tpu.pipeline_mode<synchronous>, transform_indices = @transform_3, window_bounds = array<i64: 128, 128>}, {pipeline_mode = #tpu.pipeline_mode<synchronous>, transform_indices = @transform_4, window_bounds = array<i64: 1, 128>}, {transform_indices = @transform_5, window_bounds = array<i64: 16, 128>}]} {
    %c0 = arith.constant 0 : index
    %c0_0 = arith.constant 0 : index
    %0 = vector.load %arg1[%c0, %c0_0] : memref<16x128xf32, #tpu.memory_space<vmem>>, vector<16x128xf32>
    %1 = arith.truncf %0 : vector<16x128xf32> to vector<16x128xbf16>
    %c0_1 = arith.constant 0 : index
    %c0_2 = arith.constant 0 : index
    %2 = vector.load %arg2[%c0_1, %c0_2] : memref<128x128xbf16, #tpu.memory_space<vmem>>, vector<128x128xbf16>
    %cst = arith.constant dense<0.000000e+00> : vector<16x128xf32>
    %3 = tpu.matmul %1, %2, %cst {dimension_numbers = #tpu.dot_dimension_numbers<[1], [0], [0], [1], [0, 0, 1, 1], [], []>} : vector<16x128xbf16>, vector<128x128xbf16>, vector<16x128xf32> -> vector<16x128xf32>
    %c0_3 = arith.constant 0 : index
    %c0_4 = arith.constant 0 : index
    %4 = vector.load %arg3[%c0_3, %c0_4] : memref<1x128xf32, #tpu.memory_space<vmem>>, vector<1x128xf32>
    %5 = vector.broadcast %4 : vector<1x128xf32> to vector<16x128xf32>
    %6 = arith.addf %3, %5 : vector<16x128xf32>
    %cst_5 = arith.constant 0.000000e+00 : f32
    %7 = vector.broadcast %cst_5 : f32 to vector<16x128xf32>
    %8 = arith.maximumf %6, %7 : vector<16x128xf32>
    %9 = arith.truncf %8 : vector<16x128xf32> to vector<16x128xbf16>
    %c0_6 = arith.constant 0 : index
    %c0_7 = arith.constant 0 : index
    %10 = vector.load %arg4[%c0_6, %c0_7] : memref<128x128xbf16, #tpu.memory_space<vmem>>, vector<128x128xbf16>
    %cst_8 = arith.constant dense<0.000000e+00> : vector<16x128xf32>
    %11 = tpu.matmul %9, %10, %cst_8 {dimension_numbers = #tpu.dot_dimension_numbers<[1], [0], [0], [1], [0, 0, 1, 1], [], []>} : vector<16x128xbf16>, vector<128x128xbf16>, vector<16x128xf32> -> vector<16x128xf32>
    %c0_9 = arith.constant 0 : index
    %c0_10 = arith.constant 0 : index
    %12 = vector.load %arg5[%c0_9, %c0_10] : memref<1x128xf32, #tpu.memory_space<vmem>>, vector<1x128xf32>
    %13 = vector.broadcast %12 : vector<1x128xf32> to vector<16x128xf32>
    %14 = arith.addf %11, %13 : vector<16x128xf32>
    %c0_11 = arith.constant 0 : index
    %c0_12 = arith.constant 0 : index
    %15 = vector.load %arg6[%c0_11, %c0_12] : memref<16x128xf32, #tpu.memory_space<vmem>>, vector<16x128xf32>
    tpu.vector_store %arg6[%c0_11, %c0_12], %14 {strides = array<i32>} : memref<16x128xf32, #tpu.memory_space<vmem>>, vector<16x128xf32>,
    return
  }
  func.func @transform_0(%arg0: i32) -> (i32, i32) {
    %c0_i32 = arith.constant 0 : i32
    %c0_i32_0 = arith.constant 0 : i32
    return %arg0, %c0_i32 : i32, i32
  }
  func.func @transform_1(%arg0: i32) -> (i32, i32) {
    %c0_i32 = arith.constant 0 : i32
    %c0_i32_0 = arith.constant 0 : i32
    %c0_i32_1 = arith.constant 0 : i32
    return %c0_i32, %c0_i32_0 : i32, i32
  }
  func.func @transform_2(%arg0: i32) -> (i32, i32) {
    %c0_i32 = arith.constant 0 : i32
    %c0_i32_0 = arith.constant 0 : i32
    %c0_i32_1 = arith.constant 0 : i32
    return %c0_i32, %c0_i32_0 : i32, i32
  }
  func.func @transform_3(%arg0: i32) -> (i32, i32) {
    %c0_i32 = arith.constant 0 : i32
    %c0_i32_0 = arith.constant 0 : i32
    %c0_i32_1 = arith.constant 0 : i32
    return %c0_i32, %c0_i32_0 : i32, i32
  }
  func.func @transform_4(%arg0: i32) -> (i32, i32) {
    %c0_i32 = arith.constant 0 : i32
    %c0_i32_0 = arith.constant 0 : i32
    %c0_i32_1 = arith.constant 0 : i32
    return %c0_i32, %c0_i32_0 : i32, i32
  }
  func.func @transform_5(%arg0: i32) -> (i32, i32) {
    %c0_i32 = arith.constant 0 : i32
    %c0_i32_0 = arith.constant 0 : i32
    return %arg0, %c0_i32 : i32, i32
  }
}

</mosaic_0001>

<bundles_post_ra>
// kernel: positionwise_feed_forward.1
= control target key start
LH: loop header
LB: loop body
LE: loop exit
PB: predicated region body
PF: predicated region fallthrough
CT: control target
= control target key end

     0   :  { %10 = vsyncpa [#allocation3], 0  ;;  %s511_s0 = inlined_call_operand.vmem [shape: f32[16,128], index: 0, kind: input, shape index: {}]   ;;  %s512_s1 = inlined_call_operand.hbm [shape: bf16[128,128], index: 1, kind: input, shape index: {}]   ;;  %s513_s2 = inlined_call_operand.vmem [shape: f32[1,128], index: 2, kind: input, shape index: {}]   ;;  %s514_s3 = inlined_call_operand.hbm [shape: bf16[128,128], index: 3, kind: input, shape index: {}]   ;;  %s515_s4 = inlined_call_operand.vmem [shape: f32[1,128], index: 4, kind: input, shape index: {}]   ;;  %s516_s5 = inlined_call_operand.vmem [shape: f32[16,128], index: 5, kind: output, shape index: {}]  }
   0x1   :  { %11 = vsyncpa [#allocation5], 0  ;;  %s433_s18 = smov [#allocation2]   ;;  %s385_s22 = scalar_lea.hbm %s512_s1, 1024 }
   0x2   :  { %s19_s19 = sshll.u32 %s433_s18, 4  ;;  %p386_p0 = scmp.ne.s32.totalorder %s512_s1, %s385_s22  ;;  %s20_s19 = int_to_ptr.vmem [resolvable:$true] %s19_s19 }
   0x3   :  { %p389_p1 = scmp.lt.u32.totalorder %s385_s22, %s512_s1 }
   0x5   :  { %p391_p2 = pnand %p389_p1, %p386_p0 }
   0x7   :  { %394 = shalt.err (!%p391_p2)
}
   0x8   :  { %s395_s27 = scalar_lea.vmem %s20_s19, 1024  ;;  %p400_p4 = scmp.lt.s32.totalorder %s20_s19, %s20_s19 }
   0x9   :  { %p396_p3 = scmp.ne.s32.totalorder %s20_s19, %s395_s27  ;;  %p401_p5 = scmp.lt.s32.totalorder %s395_s27, %s395_s27 }
   0xb   :  { %p402_p6 = por %p401_p5, %p400_p4 }
   0xd   :  { %p403_p7 = pnand %p402_p6, %p396_p3 }
   0xf   :  { %406 = shalt.err (!%p403_p7)
}
  0x10   :  { %s434_s28 = smov 64   ;;  %s435_s29 = smov 4  }
  0x11   :  { %25 = dma.hbm_to_vmem [thread:$0]  %s512_s1, 1024, %s20_s19, [#allocation3], %s434_s28, %s434_s28, %s435_s29  }
  0x12   :  { %s436_s7 = smov [#allocation4]   ;;  %s407_s11 = scalar_lea.hbm %s514_s3, 1024 }
  0x13   :  { %s33_s8 = sshll.u32 %s436_s7, 4  ;;  %p408_p8 = scmp.ne.s32.totalorder %s514_s3, %s407_s11  ;;  %s34_s8 = int_to_ptr.vmem [resolvable:$true] %s33_s8 }
  0x14   :  { %p411_p9 = scmp.lt.u32.totalorder %s407_s11, %s514_s3 }
  0x16   :  { %p413_p10 = pnand %p411_p9, %p408_p8 }
  0x18   :  { %416 = shalt.err (!%p413_p10)
}
  0x19   :  { %s417_s16 = scalar_lea.vmem %s34_s8, 1024  ;;  %p422_p12 = scmp.lt.s32.totalorder %s34_s8, %s34_s8 }
  0x1a   :  { %p418_p11 = scmp.ne.s32.totalorder %s34_s8, %s417_s16  ;;  %p423_p13 = scmp.lt.s32.totalorder %s417_s16, %s417_s16 }
  0x1c   :  { %p424_p0 = por %p423_p13, %p422_p12 }
  0x1e   :  { %p425_p1 = pnand %p424_p0, %p418_p11 }
  0x20   :  { %428 = shalt.err (!%p425_p1)
}
  0x21   :  { %39 = dma.hbm_to_vmem [thread:$0]  %s514_s3, 1024, %s34_s8, [#allocation5], %s434_s28, %s434_s28, %s435_s29  }
  0x22   :  { %429 = dma.done.wait [#allocation3], 1024  }
  0x23   :  { %430 = vsyncadd [#allocation3], 4294966272 }
  0x24   :  { %431 = dma.done.wait [#allocation5], 1024  }
  0x25   :  { %432 = vsyncadd [#allocation5], 4294966272  ;;  %v437_v0 = vmov 0.0   ;;  %vm438_vm0 = vmmov 0   ;;  %v369_v1 = vld [vmem:[#allocation2] sm:$0xff]   ;;  %v370_v2 = vld [vmem:[#allocation2 + $0x8] sm:$0xff]  }
  0x26   :  { %323 = vmatprep.subr.bf16.mxu0 %v437_v0  ;;  %339 = vmatprep.mubr.msk.bf16.mxu0 %vm438_vm0, %v437_v0  ;;  %v371_v3 = vld [vmem:[#allocation2 + $0x10] sm:$0xff]   ;;  %v377_v4 = vld [vmem:[#allocation4] sm:$0xff]   ;;  %v372_v5 = vld [vmem:[#allocation2 + $0x18] sm:$0xff]  }
  0x27   :  { %343 = vmatprep.subr.bf16.mxu1 %v437_v0  ;;  %359 = vmatprep.mubr.msk.bf16.mxu1 %vm438_vm0, %v437_v0  ;;  %v378_v6 = vld [vmem:[#allocation4 + $0x8] sm:$0xff]   ;;  %v373_v7 = vld [vmem:[#allocation2 + $0x20] sm:$0xff]   ;;  %v379_v8 = vld [vmem:[#allocation4 + $0x10] sm:$0xff]  }
  0x28   :  { %324 = vmatpush3.bf16.msra.mxu0 %v369_v1  ;;  %344 = vmatpush3.bf16.msra.mxu1 %v377_v4  ;;  %v374_v9 = vld [vmem:[#allocation2 + $0x28] sm:$0xff]   ;;  %v380_v10 = vld [vmem:[#allocation4 + $0x18] sm:$0xff]   ;;  %v375_v11 = vld [vmem:[#allocation2 + $0x30] sm:$0xff]  }
  0x29   :  { %325 = vmatprep.subr.bf16.mxu0 %v437_v0  ;;  %345 = vmatprep.subr.bf16.mxu1 %v437_v0  ;;  %v381_v12 = vld [vmem:[#allocation4 + $0x20] sm:$0xff]   ;;  %v376_v13 = vld [vmem:[#allocation2 + $0x38] sm:$0xff]   ;;  %v50_v15 = vld [vmem:[%s511_s0 + $0x8] sm:$0xff] }
  0x2a   :  { %v49_v14 = vld [vmem:[%s511_s0] sm:$0xff]  ;;  %v382_v16 = vld [vmem:[#allocation4 + $0x28] sm:$0xff]   ;;  %v383_v18 = vld [vmem:[#allocation4 + $0x30] sm:$0xff]  }
  0x2b   :  { %v51_v17 = vpack.c.bf16 %v50_v15, %v49_v14  ;;  %v384_v19 = vld [vmem:[#allocation4 + $0x38] sm:$0xff]   ;;  %v287_v20 = vld [vmem:[%s513_s2] ss:$0 sm:$0xff] }
  0x2c   :  { %326 = vmatpush3.bf16.msra.mxu0 %v370_v2  ;;  %346 = vmatpush3.bf16.msra.mxu1 %v378_v6  ;;  %v296_v30 = vld [vmem:[%s515_s4] ss:$0 sm:$0xff] }
  0x2d   :  { %327 = vmatprep.subr.bf16.mxu0 %v437_v0  ;;  %347 = vmatprep.subr.bf16.mxu1 %v437_v0 }
  0x30   :  { %328 = vmatpush3.bf16.msra.mxu0 %v371_v3  ;;  %348 = vmatpush3.bf16.msra.mxu1 %v379_v8 }
  0x31   :  { %329 = vmatprep.subr.bf16.mxu0 %v437_v0  ;;  %349 = vmatprep.subr.bf16.mxu1 %v437_v0 }
  0x34   :  { %330 = vmatpush3.bf16.msra.mxu0 %v372_v5  ;;  %350 = vmatpush3.bf16.msra.mxu1 %v380_v10 }
  0x35   :  { %331 = vmatprep.subr.bf16.mxu0 %v437_v0  ;;  %351 = vmatprep.subr.bf16.mxu1 %v437_v0 }
  0x38   :  { %332 = vmatpush3.bf16.msra.mxu0 %v373_v7  ;;  %352 = vmatpush3.bf16.msra.mxu1 %v381_v12 }
  0x39   :  { %333 = vmatprep.subr.bf16.mxu0 %v437_v0  ;;  %353 = vmatprep.subr.bf16.mxu1 %v437_v0 }
  0x3c   :  { %334 = vmatpush3.bf16.msra.mxu0 %v374_v9  ;;  %354 = vmatpush3.bf16.msra.mxu1 %v382_v16 }
  0x3d   :  { %335 = vmatprep.subr.bf16.mxu0 %v437_v0  ;;  %355 = vmatprep.subr.bf16.mxu1 %v437_v0 }
  0x40   :  { %336 = vmatpush3.bf16.msra.mxu0 %v375_v11  ;;  %356 = vmatpush3.bf16.msra.mxu1 %v383_v18 }
  0x41   :  { %337 = vmatprep.subr.bf16.mxu0 %v437_v0  ;;  %357 = vmatprep.subr.bf16.mxu1 %v437_v0 }
  0x44   :  { %338 = vmatpush3.bf16.msra.mxu0 %v376_v13  ;;  %358 = vmatpush3.bf16.msra.mxu1 %v384_v19 }
  0x47   :  { %340 = vmatmul.mubr.bf16.vlgmr.msra.gmra.mrb[0].mxu0 %v51_v17 }
 0x11a   :  { %v157_v21 = vpop.f32.mrb[0].mxu0 }
 0x11b   :  { %v158_v22 = vadd.f32 %v287_v20, %v157_v21  ;;  %v341_v23 = vpop.f32.mrb[1].mxu0 }
 0x11c   :  { %v160_v24 = vpop.f32.mrb[2].mxu0 }
 0x11d   :  { %v161_v25 = vadd.f32 %v287_v20, %v160_v24  ;;  %v342_v26 = vpop.f32.mrb[3].mxu0  ;;  %v164_v27 = vmax.f32 %v158_v22, 0.0 }
 0x11f   :  { %v165_v28 = vmax.f32 %v161_v25, 0.0 }
 0x121   :  { %v166_v29 = vpack.c.bf16 %v165_v28, %v164_v27 }
 0x123   :  { %360 = vmatmul.mubr.bf16.vlgmr.msra.gmra.mrb[0].mxu1 %v166_v29 }
 0x1f6   :  { %v272_v31 = vpop.f32.mrb[0].mxu1 }
 0x1f7   :  { %v273_v32 = vadd.f32 %v296_v30, %v272_v31  ;;  %v361_v33 = vpop.f32.mrb[1].mxu1 }
 0x1f8   :  { %v275_v34 = vpop.f32.mrb[2].mxu1 }
 0x1f9   :  { %279 = vst [vmem:[%s516_s5] sm:$0xff] %v273_v32  ;;  %v276_v35 = vadd.f32 %v296_v30, %v275_v34  ;;  %v362_v36 = vpop.f32.mrb[3].mxu1 }
 0x1fb   :  { %280 = vst [vmem:[%s516_s5 + $0x8] sm:$0xff] %v276_v35 }
 0x1fc   :  { %285 = vsyncpa [#allocation3], 1 }
 0x1fd   :  { %286 = vsyncpa [#allocation5], 1 }

</bundles_post_ra>
